<compile_context>
chip_gen: v5e
topology: v5e:2x2
jax: 0.10.0
libtpu: 0.0.40
codegen_flags: <defaults>
</compile_context>

<pallas_src>
import jax
import jax.numpy as jnp
from jax.experimental import pallas as pl
from jax.experimental.pallas import tpu as pltpu

FC1_DIMS = 512
FC2_DIMS = 256


def _round_up(x, m):
    return ((x + m - 1) // m) * m


def _cdiv(a, b):
    return (a + b - 1) // b


def critic_kernel(x_ref, w1_ref, b1_ref, w2_ref, b2_ref, w3_ref, b3_ref, o_ref):
    # fc1 + relu (bf16 operands on the MXU, f32 accumulation, f32 bias/relu).
    # .astype is a no-op if the caller already supplies bf16 state.
    x = x_ref[...].astype(jnp.bfloat16)
    h1 = jnp.dot(x, w1_ref[...], preferred_element_type=jnp.float32)
    h1 = jnp.maximum(h1 + b1_ref[...], 0.0)

    # fc2 + relu
    h2 = jnp.dot(h1.astype(jnp.bfloat16), w2_ref[...],
                 preferred_element_type=jnp.float32)
    h2 = jnp.maximum(h2 + b2_ref[...], 0.0)

    # q_val head: (1, 256) f32 weight row -> VPU multiply + lane reduction
    # (no wasted MXU pass, no zero-padded weight DMA). Scalar bias from SMEM.
    q_col = jnp.sum(h2 * w3_ref[...], axis=-1, keepdims=True) + b3_ref[0, 0]  # (TM, 1)

    # Lane-dense store: transpose the (TM, 1) column to a (1, TM) row so the
    # HBM writeback is an unmasked, lane-dense vst instead of TM/8 masked
    # single-lane stores. XLU slot is otherwise idle in this kernel.
    o_ref[...] = q_col.T


def _choose_tile(batch, tm_max):
    """Return (TM, B_pad): balanced, sublane-aligned batch tile and padded batch."""
    b8 = _round_up(max(batch, 1), 8)
    if b8 < 16:
        return b8, b8  # single tiny tile; nothing useful to split
    # >= 2 tiles (shards the "parallel" axis across both v7x TensorCores; one
    # extra grid step on single-core v5e/v6e is noise), <= tm_max rows per tile,
    # balanced so unlucky batch sizes never pad up to ~2x.
    n_tiles = max(2, _cdiv(b8, tm_max))
    tm = _round_up(_cdiv(b8, n_tiles), 8)
    b_pad = _round_up(b8, tm)
    return tm, b_pad


def critic_forward(state, params, *, tm=512):
    """state: (B, input_dims) float32 (or bfloat16). Returns (B, 1) float32."""
    w1, b1, w2, b2, w3, b3 = params
    B, K = state.shape

    TM, B_pad = _choose_tile(B, tm)
    if B_pad != B:
        state = jnp.pad(state, ((0, B_pad - B), (0, 0)))
    n_tiles = B_pad // TM

    # Weights/biases use a constant index_map so they stay VMEM-resident across
    # the batch grid; only the state/output tiles move per step.
    const = lambda arr: pl.BlockSpec(arr.shape, lambda i: (0, 0))

    out = pl.pallas_call(
        critic_kernel,
        # Lane-dense output slab: one (1, TM) row per grid step.
        out_shape=jax.ShapeDtypeStruct((n_tiles, TM), jnp.float32),
        grid=(n_tiles,),
        in_specs=[
            pl.BlockSpec((TM, K), lambda i: (i, 0)),
            const(w1), const(b1),
            const(w2), const(b2),
            const(w3),
            pl.BlockSpec(memory_space=pltpu.MemorySpace.SMEM),  # scalar q bias
        ],
        out_specs=pl.BlockSpec((1, TM), lambda i: (i, 0)),
        compiler_params=pltpu.CompilerParams(
            dimension_semantics=("parallel",),
        ),
    )(state, w1, b1, w2, b2, w3, b3)

    # Row-major (n_tiles, TM) == padded batch order; drop padding, restore (B, 1).
    return out.reshape(B_pad)[:B].reshape(B, 1)


def init_params(key, input_dims):
    """Deterministic init mimicking PyTorch nn.Linear default (uniform +-1/sqrt(fan_in)).

    fc1/fc2 weights are bfloat16 (intentional deviation from the f32 PyTorch
    module; f32 accumulation in-kernel); biases stay f32. The q-head weight is
    a float32 (1, FC2_DIMS) row for the in-kernel VPU reduction, and its bias
    is a (1, 1) f32 scalar that the kernel reads from SMEM.
    """
    ks = jax.random.split(key, 6)

    def lin(kw, kb, fan_in, fan_out):
        bound = 1.0 / jnp.sqrt(jnp.float32(fan_in))
        w = jax.random.uniform(kw, (fan_in, fan_out), jnp.float32, -bound, bound)
        b = jax.random.uniform(kb, (1, fan_out), jnp.float32, -bound, bound)
        return w, b

    w1, b1 = lin(ks[0], ks[1], input_dims, FC1_DIMS)
    w2, b2 = lin(ks[2], ks[3], FC1_DIMS, FC2_DIMS)
    w3, b3 = lin(ks[4], ks[5], FC2_DIMS, 1)

    return (
        w1.astype(jnp.bfloat16), b1,
        w2.astype(jnp.bfloat16), b2,
        w3.T,                       # (1, FC2_DIMS) f32 row
        b3,                         # (1, 1) f32
    )


def critic_ref(state, params):
    """Pure-JAX reference using the same bf16 weights / f32 accumulation."""
    w1, b1, w2, b2, w3_row, b3 = params
    x = state.astype(jnp.bfloat16)
    h1 = jnp.maximum(
        jnp.dot(x, w1, preferred_element_type=jnp.float32) + b1, 0.0)
    h2 = jnp.maximum(
        jnp.dot(h1.astype(jnp.bfloat16), w2,
                preferred_element_type=jnp.float32) + b2, 0.0)
    return jnp.sum(h2 * w3_row, axis=-1, keepdims=True) + b3


if __name__ == "__main__":
    key = jax.random.PRNGKey(0)
    k_params, k_state = jax.random.split(key)

    batch = 8
    input_dims = 32  # flat observation vector for an FC critic

    params = init_params(k_params, input_dims)
    state = jax.random.normal(k_state, (batch, input_dims), jnp.float32)

    q_val = critic_forward(state, params)
    q_val = jax.block_until_ready(q_val)

    q_ref = critic_ref(state, params)
    assert q_val.shape == (batch, 1), q_val.shape
    assert jnp.allclose(q_val, q_ref, atol=2e-3, rtol=2e-3), "mismatch vs reference"

    print("KERNEL_OK")
</pallas_src>

<mosaic_0001>
module attributes {stable_mosaic.version = 11 : i64} {
  func.func @critic_kernel(%arg0: i32, %arg1: memref<8x32xf32, #tpu.memory_space<vmem>>, %arg2: memref<32x512xbf16, #tpu.memory_space<vmem>>, %arg3: memref<1x512xf32, #tpu.memory_space<vmem>>, %arg4: memref<512x256xbf16, #tpu.memory_space<vmem>>, %arg5: memref<1x256xf32, #tpu.memory_space<vmem>>, %arg6: memref<1x256xf32, #tpu.memory_space<vmem>>, %arg7: memref<1x1xf32, #tpu.memory_space<smem>>, %arg8: memref<1x8xf32, #tpu.memory_space<vmem>>) attributes {dimension_semantics = [#tpu.dimension_semantics<parallel>], iteration_bounds = array<i64: 1>, scalar_prefetch = 0 : i64, scratch_operands = 0 : i64, tpu.core_type = #tpu.core_type<tc>, window_params = [{transform_indices = @transform_0, window_bounds = array<i64: 8, 32>}, {pipeline_mode = #tpu.pipeline_mode<synchronous>, transform_indices = @transform_1, window_bounds = array<i64: 32, 512>}, {pipeline_mode = #tpu.pipeline_mode<synchronous>, transform_indices = @transform_2, window_bounds = array<i64: 1, 512>}, {pipeline_mode = #tpu.pipeline_mode<synchronous>, transform_indices = @transform_3, window_bounds = array<i64: 512, 256>}, {pipeline_mode = #tpu.pipeline_mode<synchronous>, transform_indices = @transform_4, window_bounds = array<i64: 1, 256>}, {pipeline_mode = #tpu.pipeline_mode<synchronous>, transform_indices = @transform_5, window_bounds = array<i64: 1, 256>}, {transform_indices = @transform_6, window_bounds = array<i64: 1, 1>}, {transform_indices = @transform_7, window_bounds = array<i64: 1, 8>}]} {
    %c0 = arith.constant 0 : index
    %c0_0 = arith.constant 0 : index
    %0 = vector.load %arg1[%c0, %c0_0] : memref<8x32xf32, #tpu.memory_space<vmem>>, vector<8x32xf32>
    %1 = arith.truncf %0 : vector<8x32xf32> to vector<8x32xbf16>
    %c0_1 = arith.constant 0 : index
    %c0_2 = arith.constant 0 : index
    %2 = vector.load %arg2[%c0_1, %c0_2] : memref<32x512xbf16, #tpu.memory_space<vmem>>, vector<32x512xbf16>
    %cst = arith.constant dense<0.000000e+00> : vector<8x512xf32>
    %3 = tpu.matmul %1, %2, %cst {dimension_numbers = #tpu.dot_dimension_numbers<[1], [0], [0], [1], [0, 0, 1, 1], [], []>} : vector<8x32xbf16>, vector<32x512xbf16>, vector<8x512xf32> -> vector<8x512xf32>
    %c0_3 = arith.constant 0 : index
    %c0_4 = arith.constant 0 : index
    %4 = vector.load %arg3[%c0_3, %c0_4] : memref<1x512xf32, #tpu.memory_space<vmem>>, vector<1x512xf32>
    %5 = vector.broadcast %4 : vector<1x512xf32> to vector<8x512xf32>
    %6 = arith.addf %3, %5 : vector<8x512xf32>
    %cst_5 = arith.constant 0.000000e+00 : f32
    %7 = vector.broadcast %cst_5 : f32 to vector<8x512xf32>
    %8 = arith.maximumf %6, %7 : vector<8x512xf32>
    %9 = arith.truncf %8 : vector<8x512xf32> to vector<8x512xbf16>
    %c0_6 = arith.constant 0 : index
    %c0_7 = arith.constant 0 : index
    %10 = vector.load %arg4[%c0_6, %c0_7] : memref<512x256xbf16, #tpu.memory_space<vmem>>, vector<512x256xbf16>
    %cst_8 = arith.constant dense<0.000000e+00> : vector<8x256xf32>
    %11 = tpu.matmul %9, %10, %cst_8 {dimension_numbers = #tpu.dot_dimension_numbers<[1], [0], [0], [1], [0, 0, 1, 1], [], []>} : vector<8x512xbf16>, vector<512x256xbf16>, vector<8x256xf32> -> vector<8x256xf32>
    %c0_9 = arith.constant 0 : index
    %c0_10 = arith.constant 0 : index
    %12 = vector.load %arg5[%c0_9, %c0_10] : memref<1x256xf32, #tpu.memory_space<vmem>>, vector<1x256xf32>
    %13 = vector.broadcast %12 : vector<1x256xf32> to vector<8x256xf32>
    %14 = arith.addf %11, %13 : vector<8x256xf32>
    %cst_11 = arith.constant 0.000000e+00 : f32
    %15 = vector.broadcast %cst_11 : f32 to vector<8x256xf32>
    %16 = arith.maximumf %14, %15 : vector<8x256xf32>
    %c0_12 = arith.constant 0 : index
    %c0_13 = arith.constant 0 : index
    %17 = vector.load %arg6[%c0_12, %c0_13] : memref<1x256xf32, #tpu.memory_space<vmem>>, vector<1x256xf32>
    %18 = vector.broadcast %17 : vector<1x256xf32> to vector<8x256xf32>
    %19 = arith.mulf %16, %18 : vector<8x256xf32>
    %cst_14 = arith.constant dense<0.000000e+00> : vector<8xf32>
    %20 = vector.multi_reduction <add>, %19, %cst_14 [1] : vector<8x256xf32> to vector<8xf32>
    %21 = vector.shape_cast %20 : vector<8xf32> to vector<8x1xf32>
    %c0_15 = arith.constant 0 : index
    %c0_16 = arith.constant 0 : index
    %22 = memref.load %arg7[%c0_15, %c0_16] : memref<1x1xf32, #tpu.memory_space<smem>>
    %23 = vector.broadcast %22 : f32 to vector<8x1xf32>
    %24 = arith.addf %21, %23 : vector<8x1xf32>
    %25 = tpu.transpose %24, [1, 0] : vector<8x1xf32> -> vector<1x8xf32>
    %c0_17 = arith.constant 0 : index
    %c0_18 = arith.constant 0 : index
    %26 = vector.load %arg8[%c0_17, %c0_18] : memref<1x8xf32, #tpu.memory_space<vmem>>, vector<1x8xf32>
    tpu.vector_store %arg8[%c0_17, %c0_18], %25 {strides = array<i32>} : memref<1x8xf32, #tpu.memory_space<vmem>>, vector<1x8xf32>,
    return
  }
  func.func @transform_0(%arg0: i32) -> (i32, i32) {
    %c0_i32 = arith.constant 0 : i32
    %c0_i32_0 = arith.constant 0 : i32
    return %arg0, %c0_i32 : i32, i32
  }
  func.func @transform_1(%arg0: i32) -> (i32, i32) {
    %c0_i32 = arith.constant 0 : i32
    %c0_i32_0 = arith.constant 0 : i32
    %c0_i32_1 = arith.constant 0 : i32
    return %c0_i32, %c0_i32_0 : i32, i32
  }
  func.func @transform_2(%arg0: i32) -> (i32, i32) {
    %c0_i32 = arith.constant 0 : i32
    %c0_i32_0 = arith.constant 0 : i32
    %c0_i32_1 = arith.constant 0 : i32
    return %c0_i32, %c0_i32_0 : i32, i32
  }
  func.func @transform_3(%arg0: i32) -> (i32, i32) {
    %c0_i32 = arith.constant 0 : i32
    %c0_i32_0 = arith.constant 0 : i32
    %c0_i32_1 = arith.constant 0 : i32
    return %c0_i32, %c0_i32_0 : i32, i32
  }
  func.func @transform_4(%arg0: i32) -> (i32, i32) {
    %c0_i32 = arith.constant 0 : i32
    %c0_i32_0 = arith.constant 0 : i32
    %c0_i32_1 = arith.constant 0 : i32
    return %c0_i32, %c0_i32_0 : i32, i32
  }
  func.func @transform_5(%arg0: i32) -> (i32, i32) {
    %c0_i32 = arith.constant 0 : i32
    %c0_i32_0 = arith.constant 0 : i32
    %c0_i32_1 = arith.constant 0 : i32
    return %c0_i32, %c0_i32_0 : i32, i32
  }
  func.func @transform_6(%arg0: i32) -> (i32, i32) {
    %c0_i32 = arith.constant 0 : i32
    %c0_i32_0 = arith.constant 0 : i32
    %c0_i32_1 = arith.constant 0 : i32
    return %c0_i32, %c0_i32_0 : i32, i32
  }
  func.func @transform_7(%arg0: i32) -> (i32, i32) {
    %c0_i32 = arith.constant 0 : i32
    %c0_i32_0 = arith.constant 0 : i32
    return %arg0, %c0_i32 : i32, i32
  }
}

</mosaic_0001>

<bundles_post_ra>
// kernel: tpu_custom_call.1
= control target key start
LH: loop header
LB: loop body
LE: loop exit
PB: predicated region body
PF: predicated region fallthrough
CT: control target
= control target key end

     0   :  { %13 = vsyncpa [#allocation4], 0  ;;  %s1354_s0 = inlined_call_operand.hbm [shape: f32[8,32], index: 0, kind: input, shape index: {}]   ;;  %s1355_s1 = inlined_call_operand.hbm [shape: bf16[32,512], index: 1, kind: input, shape index: {}]   ;;  %s1356_s2 = inlined_call_operand.hbm [shape: f32[1,512], index: 2, kind: input, shape index: {}]   ;;  %s1357_s3 = inlined_call_operand.hbm [shape: bf16[512,256], index: 3, kind: input, shape index: {}]   ;;  %s1358_s4 = inlined_call_operand.vmem [shape: f32[1,256], index: 4, kind: input, shape index: {}]   ;;  %s1359_s5 = inlined_call_operand.vmem [shape: f32[1,256], index: 5, kind: input, shape index: {}]   ;;  %s1360_s6 = inlined_call_operand.<no memory space> [shape: f32[1,1], index: 6, kind: input, shape index: {}]   ;;  %s1361_s7 = inlined_call_operand.hbm [shape: f32[1,8], index: 7, kind: output, shape index: {}]  }
   0x1   :  { %14 = vsyncpa [#allocation7], 0 }
   0x2   :  { %15 = vsyncpa [#allocation10], 0  ;;  %s32_s26 = sshll.u32 %s1355_s1, 4  ;;  %s33_s26 = int_to_ptr.hbm [resolvable:$true] %s32_s26 }
   0x3   :  { %16 = vsyncpa [#allocation5], 0  ;;  %s1277_s27 = smov [#allocation6]   ;;  %s22_s8 = sshll.u32 %s1354_s0, 4  ;;  %s23_s8 = int_to_ptr.hbm [resolvable:$true] %s22_s8 }
   0x4   :  { %s34_s28 = sshll.u32 %s1277_s27, 4  ;;  %s1278_s9 = smov 256   ;;  %s35_s28 = int_to_ptr.vmem [resolvable:$true] %s34_s28 }
   0x5   :  { %s1279_s10 = smov 16   ;;  %s1280_s11 = smov [#allocation3]  }
   0x6   :  { %40 = dma.hbm_to_vmem [thread:$0]  %s33_s26, 1024, %s35_s28, [#allocation7], %s1278_s9, %s1278_s9, %s1279_s10  }
   0x7   :  { %s24_s12 = sshll.u32 %s1280_s11, 4  ;;  %s46_s15 = sshll.u32 %s1356_s2, 4  ;;  %s25_s12 = int_to_ptr.vmem [resolvable:$true] %s24_s12  ;;  %s47_s15 = int_to_ptr.hbm [resolvable:$true] %s46_s15 }
   0x8   :  { %27 = dma.hbm_to_vmem [thread:$0]  %s23_s8, 128, %s25_s12, [#allocation4]  }
   0x9   :  { %s56_s17 = sshll.u32 %s1357_s3, 4  ;;  %s1281_s18 = smov [#allocation8]   ;;  %s57_s17 = int_to_ptr.hbm [resolvable:$true] %s56_s17 }
   0xa   :  { %s48_s19 = sshll.u32 %s1281_s18, 4  ;;  %s1282_s0 = smov [#allocation9]   ;;  %s49_s19 = int_to_ptr.vmem [resolvable:$true] %s48_s19 }
   0xb   :  { %51 = dma.hbm_to_vmem [thread:$0]  %s47_s15, 64, %s49_s19, [#allocation7]  }
   0xc   :  { %s58_s20 = sshll.u32 %s1282_s0, 4  ;;  %s1283_s21 = smov 128   ;;  %s59_s20 = int_to_ptr.vmem [resolvable:$true] %s58_s20 }
   0xd   :  { %s1284_s22 = smov 8  }
   0xe   :  { %64 = dma.hbm_to_vmem [thread:$0]  %s57_s17, 8192, %s59_s20, [#allocation10], %s1283_s21, %s1283_s21, %s1284_s22  }
   0xf   :  { %1269 = dma.done.wait [#allocation4], 128  }
  0x10   :  { %1270 = vsyncadd [#allocation4], 4294967168 }
  0x11   :  { %1271 = dma.done.wait [#allocation7], 1088  }
  0x12   :  { %1272 = vsyncadd [#allocation7], 4294966208 }
  0x13   :  { %1273 = dma.done.wait [#allocation10], 8192  }
  0x14   :  { %1274 = vsyncadd [#allocation10], 4294959104  ;;  %v793_v0 = vld [vmem:[#allocation6 + $0x20] sm:$0xf]  ;;  %v1073_v1 = vld [vmem:[#allocation6 + $0x2c] sm:$0xf0] }
  0x15   :  { %v1071_v2 = vld [vmem:[#allocation6 + $0x24] sm:$0xf]  ;;  %v794_v3 = vor.u32 %v1073_v1, %v793_v0  ;;  %v795_v4 = vld [vmem:[#allocation6 + $0x30] sm:$0xf0]  ;;  %v801_v5 = vld [vmem:[#allocation6 + $0x28] sm:$0xf] }
  0x16   :  { %v1074_v6 = vld [vmem:[#allocation6 + $0x34] sm:$0xf0]  ;;  %v798_v7 = vor.u32 %v1071_v2, %v795_v4  ;;  %v1072_v9 = vld [vmem:[#allocation6 + $0x2c] sm:$0xf]  ;;  %v803_v10 = vld [vmem:[#allocation6 + $0x38] sm:$0xf0] }
  0x17   :  { %v802_v8 = vor.u32 %v1074_v6, %v801_v5  ;;  %v777_v11 = vld [vmem:[#allocation6] sm:$0xf]  ;;  %158 = vmatpush.bf16.msra.mxu0 %v794_v3  ;;  %v806_v12 = vor.u32 %v1072_v9, %v803_v10  ;;  %v1069_v13 = vld [vmem:[#allocation6 + $0xc] sm:$0xf0]  ;;  %v1067_v14 = vld [vmem:[#allocation6 + $0x4] sm:$0xf] }
  0x18   :  { %v779_v15 = vld [vmem:[#allocation6 + $0x10] sm:$0xf0]  ;;  %171 = vmatpush.bf16.msra.mxu1 %v798_v7  ;;  %v778_v16 = vor.u32 %v1069_v13, %v777_v11  ;;  %v785_v18 = vld [vmem:[#allocation6 + $0x8] sm:$0xf]  ;;  %v1070_v19 = vld [vmem:[#allocation6 + $0x14] sm:$0xf0] }
  0x19   :  { %184 = vmatpush.bf16.msra.mxu2 %v802_v8  ;;  %v782_v17 = vor.u32 %v1067_v14, %v779_v15  ;;  %v1068_v20 = vld [vmem:[#allocation6 + $0xc] sm:$0xf]  ;;  %197 = vmatpush.bf16.msra.mxu3 %v806_v12  ;;  %v786_v21 = vor.u32 %v1070_v19, %v785_v18  ;;  %v787_v22 = vld [vmem:[#allocation6 + $0x18] sm:$0xf0]  ;;  %vm148_vm0 = vcmask 261120   ;;  %s763_s29 = sshll.u32 %s1361_s7, 4  ;;  %s764_s29 = int_to_ptr.hbm [resolvable:$true] %s763_s29 }
  0x1a   :  { %v88_v23 = vld [vmem:[#allocation3] sm:$0xff]  ;;  %v869_v24 = vld [vmem:[#allocation9 + $0x70] sm:$0xf]  ;;  %v790_v25 = vor.u32 %v1068_v20, %v787_v22  ;;  %v861_v32 = vld [vmem:[#allocation9 + $0x60] sm:$0xf]  ;;  %vm754_vm1 = vcmask 57344  }
  0x1b   :  { %v89_v26 = vpack.c.bf16 %v88_v23, %v88_v23  ;;  %v1090_v27 = vld [vmem:[#allocation9 + $0x74] sm:$0xf0]  ;;  %v933_v28 = vld [vmem:[#allocation9 + $0xf0] sm:$0xf]  ;;  %159 = vmatpush.bf16.msra.mxu0 %v778_v16  ;;  %v1088_v33 = vld [vmem:[#allocation9 + $0x64] sm:$0xf0] }
  0x1c   :  { %v1106_v29 = vld [vmem:[#allocation9 + $0xf4] sm:$0xf0]  ;;  %v870_v30 = vor.u32 %v1090_v27, %v869_v24  ;;  %v925_v34 = vld [vmem:[#allocation9 + $0xe0] sm:$0xf]  ;;  %172 = vmatpush.bf16.msra.mxu1 %v782_v17  ;;  %v1104_v35 = vld [vmem:[#allocation9 + $0xe4] sm:$0xf0]  ;;  %v862_v38 = vor.u32 %v1088_v33, %v861_v32 }
  0x1d   :  { %v934_v31 = vor.u32 %v1106_v29, %v933_v28  ;;  %185 = vmatpush.bf16.msra.mxu2 %v786_v21  ;;  %v997_v36 = vld [vmem:[#allocation9 + $0x170] sm:$0xf]  ;;  %v1122_v37 = vld [vmem:[#allocation9 + $0x174] sm:$0xf0]  ;;  %198 = vmatpush.bf16.msra.mxu3 %v790_v25  ;;  %v926_v43 = vor.u32 %v1104_v35, %v925_v34  ;;  %v989_v48 = vld [vmem:[#allocation9 + $0x160] sm:$0xf] }
  0x1e   :  { %v998_v39 = vor.u32 %v1122_v37, %v997_v36  ;;  %v1061_v40 = vld [vmem:[#allocation9 + $0x1f0] sm:$0xf]  ;;  %v1138_v41 = vld [vmem:[#allocation9 + $0x1f4] sm:$0xf0]  ;;  %807 = vmatmul.msk.bf16.vlgmr.msra.gmra.mxu0 %vm148_vm0, %v89_v26  ;;  %v1120_v49 = vld [vmem:[#allocation9 + $0x164] sm:$0xf0] }
  0x1f   :  { %602 = vmatpush.bf16.msrb.mxu0 %v870_v30  ;;  %v853_v42 = vld [vmem:[#allocation9 + $0x50] sm:$0xf]  ;;  %v1062_v44 = vor.u32 %v1138_v41, %v1061_v40  ;;  %v1086_v45 = vld [vmem:[#allocation9 + $0x54] sm:$0xf0]  ;;  %808 = vmatmul.msk.bf16.vlgmr.msra.gmra.mxu1 %vm148_vm0, %v89_v26  ;;  %v1053_v50 = vld [vmem:[#allocation9 + $0x1e0] sm:$0xf]  ;;  %v990_v51 = vor.u32 %v1120_v49, %v989_v48 }
  0x20   :  { %615 = vmatpush.bf16.msrb.mxu1 %v934_v31  ;;  %v917_v46 = vld [vmem:[#allocation9 + $0xd0] sm:$0xf]  ;;  %v1102_v47 = vld [vmem:[#allocation9 + $0xd4] sm:$0xf0]  ;;  %809 = vmatmul.msk.bf16.vlgmr.msra.gmra.mxu2 %vm148_vm0, %v89_v26  ;;  %v1136_v52 = vld [vmem:[#allocation9 + $0x1e4] sm:$0xf0]  ;;  %v854_v53 = vor.u32 %v1086_v45, %v853_v42 }
  0x21   :  { %810 = vmatmul.msk.bf16.vlgmr.msra.gmra.mxu3 %vm148_vm0, %v89_v26  ;;  %628 = vmatpush.bf16.msrb.mxu2 %v998_v39  ;;  %v1054_v54 = vor.u32 %v1136_v52, %v1053_v50  ;;  %v845_v55 = vld [vmem:[#allocation9 + $0x40] sm:$0xf]  ;;  %v1084_v56 = vld [vmem:[#allocation9 + $0x44] sm:$0xf0]  ;;  %v981_v57 = vld [vmem:[#allocation9 + $0x150] sm:$0xf]  ;;  %v918_v58 = vor.u32 %v1102_v47, %v917_v46 }
  0x22   :  { %641 = vmatpush.bf16.msrb.mxu3 %v1062_v44  ;;  %v1118_v59 = vld [vmem:[#allocation9 + $0x154] sm:$0xf0]  ;;  %v1045_v60 = vld [vmem:[#allocation9 + $0x1d0] sm:$0xf]  ;;  %v909_v62 = vld [vmem:[#allocation9 + $0xc0] sm:$0xf]  ;;  %v846_v1 = vor.u32 %v1084_v56, %v845_v55 }
  0x23   :  { %603 = vmatpush.bf16.msrb.mxu0 %v862_v38  ;;  %v1134_v61 = vld [vmem:[#allocation9 + $0x1d4] sm:$0xf0]  ;;  %v1100_v63 = vld [vmem:[#allocation9 + $0xc4] sm:$0xf0]  ;;  %v982_v0 = vor.u32 %v1118_v59, %v981_v57  ;;  %v837_v3 = vld [vmem:[#allocation9 + $0x30] sm:$0xf] }
  0x24   :  { %616 = vmatpush.bf16.msrb.mxu1 %v926_v43  ;;  %v1046_v2 = vor.u32 %v1134_v61, %v1045_v60  ;;  %v973_v4 = vld [vmem:[#allocation9 + $0x140] sm:$0xf]  ;;  %v1116_v5 = vld [vmem:[#allocation9 + $0x144] sm:$0xf0]  ;;  %v910_v6 = vor.u32 %v1100_v63, %v909_v62  ;;  %v1082_v7 = vld [vmem:[#allocation9 + $0x34] sm:$0xf0] }
  0x25   :  { %629 = vmatpush.bf16.msrb.mxu2 %v990_v51  ;;  %v1037_v8 = vld [vmem:[#allocation9 + $0x1c0] sm:$0xf]  ;;  %v1132_v9 = vld [vmem:[#allocation9 + $0x1c4] sm:$0xf0]  ;;  %v901_v10 = vld [vmem:[#allocation9 + $0xb0] sm:$0xf]  ;;  %v974_v12 = vor.u32 %v1116_v5, %v973_v4  ;;  %v838_v13 = vor.u32 %v1082_v7, %v837_v3 }
  0x26   :  { %642 = vmatpush.bf16.msrb.mxu3 %v1054_v54  ;;  %v1098_v11 = vld [vmem:[#allocation9 + $0xb4] sm:$0xf0]  ;;  %v1038_v14 = vor.u32 %v1132_v9, %v1037_v8  ;;  %v829_v15 = vld [vmem:[#allocation9 + $0x20] sm:$0xf]  ;;  %v965_v16 = vld [vmem:[#allocation9 + $0x130] sm:$0xf] }
  0x27   :  { %604 = vmatpush.bf16.msrb.mxu0 %v854_v53  ;;  %v1114_v17 = vld [vmem:[#allocation9 + $0x134] sm:$0xf0]  ;;  %v902_v18 = vor.u32 %v1098_v11, %v901_v10  ;;  %v1080_v19 = vld [vmem:[#allocation9 + $0x24] sm:$0xf0]  ;;  %v1029_v20 = vld [vmem:[#allocation9 + $0x1b0] sm:$0xf] }
  0x28   :  { %617 = vmatpush.bf16.msrb.mxu1 %v918_v58  ;;  %v1130_v21 = vld [vmem:[#allocation9 + $0x1b4] sm:$0xf0]  ;;  %v893_v22 = vld [vmem:[#allocation9 + $0xa0] sm:$0xf]  ;;  %v1096_v23 = vld [vmem:[#allocation9 + $0xa4] sm:$0xf0]  ;;  %v966_v24 = vor.u32 %v1114_v17, %v965_v16  ;;  %v830_v25 = vor.u32 %v1080_v19, %v829_v15 }
  0x29   :  { %630 = vmatpush.bf16.msrb.mxu2 %v982_v0  ;;  %v1030_v26 = vor.u32 %v1130_v21, %v1029_v20  ;;  %v821_v27 = vld [vmem:[#allocation9 + $0x10] sm:$0xf]  ;;  %v957_v28 = vld [vmem:[#allocation9 + $0x120] sm:$0xf]  ;;  %v1112_v29 = vld [vmem:[#allocation9 + $0x124] sm:$0xf0]  ;;  %v894_v30 = vor.u32 %v1096_v23, %v893_v22 }
  0x2a   :  { %643 = vmatpush.bf16.msrb.mxu3 %v1046_v2  ;;  %v1078_v31 = vld [vmem:[#allocation9 + $0x14] sm:$0xf0]  ;;  %v1021_v32 = vld [vmem:[#allocation9 + $0x1a0] sm:$0xf]  ;;  %v1128_v33 = vld [vmem:[#allocation9 + $0x1a4] sm:$0xf0]  ;;  %v958_v36 = vor.u32 %v1112_v29, %v957_v28 }
  0x2b   :  { %605 = vmatpush.bf16.msrb.mxu0 %v846_v1  ;;  %v885_v34 = vld [vmem:[#allocation9 + $0x90] sm:$0xf]  ;;  %v1094_v35 = vld [vmem:[#allocation9 + $0x94] sm:$0xf0]  ;;  %v813_v37 = vld [vmem:[#allocation9] sm:$0xf]  ;;  %v822_v38 = vor.u32 %v1078_v31, %v821_v27  ;;  %v1022_v39 = vor.u32 %v1128_v33, %v1021_v32 }
  0x2c   :  { %618 = vmatpush.bf16.msrb.mxu1 %v910_v6  ;;  %v1076_v40 = vld [vmem:[#allocation9 + $0x4] sm:$0xf0]  ;;  %v949_v41 = vld [vmem:[#allocation9 + $0x110] sm:$0xf]  ;;  %v1110_v42 = vld [vmem:[#allocation9 + $0x114] sm:$0xf0]  ;;  %v886_v43 = vor.u32 %v1094_v35, %v885_v34 }
  0x2d   :  { %631 = vmatpush.bf16.msrb.mxu2 %v974_v12  ;;  %v877_v44 = vld [vmem:[#allocation9 + $0x80] sm:$0xf]  ;;  %v1013_v45 = vld [vmem:[#allocation9 + $0x190] sm:$0xf]  ;;  %v1126_v46 = vld [vmem:[#allocation9 + $0x194] sm:$0xf0]  ;;  %v950_v52 = vor.u32 %v1110_v42, %v949_v41  ;;  %v814_v53 = vor.u32 %v1076_v40, %v813_v37 }
  0x2e   :  { %644 = vmatpush.bf16.msrb.mxu3 %v1038_v14  ;;  %v1092_v47 = vld [vmem:[#allocation9 + $0x84] sm:$0xf0]  ;;  %v1089_v48 = vld [vmem:[#allocation9 + $0x74] sm:$0xf]  ;;  %v871_v49 = vld [vmem:[#allocation9 + $0x78] sm:$0xf0]  ;;  %v1014_v54 = vor.u32 %v1126_v46, %v1013_v45 }
  0x2f   :  { %606 = vmatpush.bf16.msrb.mxu0 %v838_v13  ;;  %v1105_v50 = vld [vmem:[#allocation9 + $0xf4] sm:$0xf]  ;;  %v935_v51 = vld [vmem:[#allocation9 + $0xf8] sm:$0xf0]  ;;  %v1087_v55 = vld [vmem:[#allocation9 + $0x64] sm:$0xf]  ;;  %v878_v59 = vor.u32 %v1092_v47, %v877_v44  ;;  %v874_v60 = vor.u32 %v1089_v48, %v871_v49 }
  0x30   :  { %619 = vmatpush.bf16.msrb.mxu1 %v902_v18  ;;  %v941_v56 = vld [vmem:[#allocation9 + $0x100] sm:$0xf]  ;;  %v1108_v57 = vld [vmem:[#allocation9 + $0x104] sm:$0xf0]  ;;  %v1121_v62 = vld [vmem:[#allocation9 + $0x174] sm:$0xf]  ;;  %v938_v0 = vor.u32 %v1105_v50, %v935_v51 }
  0x31   :  { %632 = vmatpush.bf16.msrb.mxu2 %v966_v24  ;;  %v1005_v58 = vld [vmem:[#allocation9 + $0x180] sm:$0xf]  ;;  %v1124_v61 = vld [vmem:[#allocation9 + $0x184] sm:$0xf0]  ;;  %v999_v63 = vld [vmem:[#allocation9 + $0x178] sm:$0xf0]  ;;  %v942_v6 = vor.u32 %v1108_v57, %v941_v56 }
  0x32   :  { %645 = vmatpush.bf16.msrb.mxu3 %v1030_v26  ;;  %v863_v1 = vld [vmem:[#allocation9 + $0x68] sm:$0xf0]  ;;  %v1137_v2 = vld [vmem:[#allocation9 + $0x1f4] sm:$0xf]  ;;  %v1063_v3 = vld [vmem:[#allocation9 + $0x1f8] sm:$0xf0]  ;;  %v1006_v7 = vor.u32 %v1124_v61, %v1005_v58  ;;  %v1002_v8 = vor.u32 %v1121_v62, %v999_v63 }
  0x33   :  { %607 = vmatpush.bf16.msrb.mxu0 %v830_v25  ;;  %v1103_v4 = vld [vmem:[#allocation9 + $0xe4] sm:$0xf]  ;;  %v927_v5 = vld [vmem:[#allocation9 + $0xe8] sm:$0xf0]  ;;  %v866_v9 = vor.u32 %v1087_v55, %v863_v1  ;;  %v1066_v10 = vor.u32 %v1137_v2, %v1063_v3  ;;  %v1085_v12 = vld [vmem:[#allocation9 + $0x54] sm:$0xf] }
  0x34   :  { %620 = vmatpush.bf16.msrb.mxu1 %v894_v30  ;;  %v930_v11 = vor.u32 %v1103_v4, %v927_v5  ;;  %v855_v13 = vld [vmem:[#allocation9 + $0x58] sm:$0xf0]  ;;  %v1101_v14 = vld [vmem:[#allocation9 + $0xd4] sm:$0xf]  ;;  %v1119_v18 = vld [vmem:[#allocation9 + $0x164] sm:$0xf] }
  0x35   :  { %633 = vmatpush.bf16.msrb.mxu2 %v958_v36  ;;  %v858_v15 = vor.u32 %v1085_v12, %v855_v13  ;;  %v919_v16 = vld [vmem:[#allocation9 + $0xd8] sm:$0xf0]  ;;  %v991_v19 = vld [vmem:[#allocation9 + $0x168] sm:$0xf0]  ;;  %v1135_v21 = vld [vmem:[#allocation9 + $0x1e4] sm:$0xf] }
  0x36   :  { %646 = vmatpush.bf16.msrb.mxu3 %v1022_v39  ;;  %v922_v17 = vor.u32 %v1101_v14, %v919_v16  ;;  %v994_v20 = vor.u32 %v1119_v18, %v991_v19  ;;  %v1055_v22 = vld [vmem:[#allocation9 + $0x1e8] sm:$0xf0]  ;;  %v1083_v24 = vld [vmem:[#allocation9 + $0x44] sm:$0xf]  ;;  %v1117_v30 = vld [vmem:[#allocation9 + $0x154] sm:$0xf] }
  0x37   :  { %608 = vmatpush.bf16.msrb.mxu0 %v822_v38  ;;  %v1058_v23 = vor.u32 %v1135_v21, %v1055_v22  ;;  %v847_v25 = vld [vmem:[#allocation9 + $0x48] sm:$0xf0]  ;;  %v1099_v26 = vld [vmem:[#allocation9 + $0xc4] sm:$0xf]  ;;  %v983_v31 = vld [vmem:[#allocation9 + $0x158] sm:$0xf0] }
  0x38   :  { %621 = vmatpush.bf16.msrb.mxu1 %v886_v43  ;;  %v850_v27 = vor.u32 %v1083_v24, %v847_v25  ;;  %v911_v28 = vld [vmem:[#allocation9 + $0xc8] sm:$0xf0]  ;;  %v1133_v32 = vld [vmem:[#allocation9 + $0x1d4] sm:$0xf]  ;;  %v986_v33 = vor.u32 %v1117_v30, %v983_v31  ;;  %v1047_v34 = vld [vmem:[#allocation9 + $0x1d8] sm:$0xf0] }
  0x39   :  { %634 = vmatpush.bf16.msrb.mxu2 %v950_v52  ;;  %v914_v29 = vor.u32 %v1099_v26, %v911_v28  ;;  %v1050_v35 = vor.u32 %v1133_v32, %v1047_v34  ;;  %v1081_v36 = vld [vmem:[#allocation9 + $0x34] sm:$0xf]  ;;  %v839_v37 = vld [vmem:[#allocation9 + $0x38] sm:$0xf0]  ;;  %v1115_v42 = vld [vmem:[#allocation9 + $0x144] sm:$0xf] }
  0x3a   :  { %647 = vmatpush.bf16.msrb.mxu3 %v1014_v54  ;;  %v842_v38 = vor.u32 %v1081_v36, %v839_v37  ;;  %v1097_v39 = vld [vmem:[#allocation9 + $0xb4] sm:$0xf]  ;;  %v903_v40 = vld [vmem:[#allocation9 + $0xb8] sm:$0xf0]  ;;  %v975_v43 = vld [vmem:[#allocation9 + $0x148] sm:$0xf0] }
  0x3b   :  { %609 = vmatpush.bf16.msrb.mxu0 %v814_v53  ;;  %v906_v41 = vor.u32 %v1097_v39, %v903_v40  ;;  %v1131_v44 = vld [vmem:[#allocation9 + $0x1c4] sm:$0xf]  ;;  %v978_v45 = vor.u32 %v1115_v42, %v975_v43  ;;  %v1039_v46 = vld [vmem:[#allocation9 + $0x1c8] sm:$0xf0]  ;;  %v1113_v54 = vld [vmem:[#allocation9 + $0x134] sm:$0xf] }
  0x3c   :  { %622 = vmatpush.bf16.msrb.mxu1 %v878_v59  ;;  %v1042_v47 = vor.u32 %v1131_v44, %v1039_v46  ;;  %v1079_v48 = vld [vmem:[#allocation9 + $0x24] sm:$0xf]  ;;  %v831_v49 = vld [vmem:[#allocation9 + $0x28] sm:$0xf0]  ;;  %v967_v55 = vld [vmem:[#allocation9 + $0x138] sm:$0xf0] }
  0x3d   :  { %635 = vmatpush.bf16.msrb.mxu2 %v942_v6  ;;  %v1095_v50 = vld [vmem:[#allocation9 + $0xa4] sm:$0xf]  ;;  %v834_v51 = vor.u32 %v1079_v48, %v831_v49  ;;  %v895_v52 = vld [vmem:[#allocation9 + $0xa8] sm:$0xf0]  ;;  %v1129_v56 = vld [vmem:[#allocation9 + $0x1b4] sm:$0xf]  ;;  %v970_v57 = vor.u32 %v1113_v54, %v967_v55 }
  0x3e   :  { %648 = vmatpush.bf16.msrb.mxu3 %v1006_v7  ;;  %v898_v53 = vor.u32 %v1095_v50, %v895_v52  ;;  %v1031_v58 = vld [vmem:[#allocation9 + $0x1b8] sm:$0xf0]  ;;  %v1093_v62 = vld [vmem:[#allocation9 + $0x94] sm:$0xf]  ;;  %v1111_v1 = vld [vmem:[#allocation9 + $0x124] sm:$0xf] }
  0x3f   :  { %654 = vmatpush.bf16.msra.mxu0 %v874_v60  ;;  %v1034_v59 = vor.u32 %v1129_v56, %v1031_v58  ;;  %v1077_v60 = vld [vmem:[#allocation9 + $0x14] sm:$0xf]  ;;  %v823_v61 = vld [vmem:[#allocation9 + $0x18] sm:$0xf0]  ;;  %v959_v2 = vld [vmem:[#allocation9 + $0x128] sm:$0xf0] }
  0x40   :  { %667 = vmatpush.bf16.msra.mxu1 %v938_v0  ;;  %v826_v63 = vor.u32 %v1077_v60, %v823_v61  ;;  %v887_v0 = vld [vmem:[#allocation9 + $0x98] sm:$0xf0]  ;;  %v962_v4 = vor.u32 %v1111_v1, %v959_v2  ;;  %v1127_v5 = vld [vmem:[#allocation9 + $0x1a4] sm:$0xf]  ;;  %v1023_v6 = vld [vmem:[#allocation9 + $0x1a8] sm:$0xf0] }
  0x41   :  { %680 = vmatpush.bf16.msra.mxu2 %v1002_v8  ;;  %v890_v3 = vor.u32 %v1093_v62, %v887_v0  ;;  %v1075_v7 = vld [vmem:[#allocation9 + $0x4] sm:$0xf]  ;;  %v1026_v8 = vor.u32 %v1127_v5, %v1023_v6  ;;  %v1109_v14 = vld [vmem:[#allocation9 + $0x114] sm:$0xf]  ;;  %v1015_v18 = vld [vmem:[#allocation9 + $0x198] sm:$0xf0] }
  0x42   :  { %693 = vmatpush.bf16.msra.mxu3 %v1066_v10  ;;  %v1091_v10 = vld [vmem:[#allocation9 + $0x84] sm:$0xf]  ;;  %v1125_v16 = vld [vmem:[#allocation9 + $0x194] sm:$0xf]  ;;  %v943_v21 = vld [vmem:[#allocation9 + $0x108] sm:$0xf0] }
  0x43   :  { %655 = vmatpush.bf16.msra.mxu0 %v866_v9  ;;  %v815_v9 = vld [vmem:[#allocation9 + $0x8] sm:$0xf0]  ;;  %v1018_v19 = vor.u32 %v1125_v16, %v1015_v18  ;;  %v1123_v22 = vld [vmem:[#allocation9 + $0x184] sm:$0xf]  ;;  %v98_v25 = vld [vmem:[#allocation8] sm:$0xf] }
  0x44   :  { %668 = vmatpush.bf16.msra.mxu1 %v930_v11  ;;  %v879_v11 = vld [vmem:[#allocation9 + $0x88] sm:$0xf0]  ;;  %v818_v12 = vor.u32 %v1075_v7, %v815_v9  ;;  %v101_v28 = vperm.slane %v98_v25, 1  ;;  %v103_v37 = vperm.slane %v98_v25, 3  ;;  %v276_v54 = vld [vmem:[%s1358_s4] sm:$0x3] }
  0x45   :  { %681 = vmatpush.bf16.msra.mxu2 %v994_v20  ;;  %v882_v13 = vor.u32 %v1091_v10, %v879_v11  ;;  %v1107_v20 = vld [vmem:[#allocation9 + $0x104] sm:$0xf]  ;;  %v1007_v24 = vld [vmem:[#allocation9 + $0x188] sm:$0xf0]  ;;  %v278_v56 = vperm.slane %v276_v54, 0 }
  0x46   :  { %694 = vmatpush.bf16.msra.mxu3 %v1058_v23  ;;  %v946_v23 = vor.u32 %v1107_v20, %v943_v21  ;;  %v1010_v26 = vor.u32 %v1123_v22, %v1007_v24  ;;  %v708_v9 = vld [vmem:[%s1359_s5] sm:$0x3]  ;;  %v720_v22 = vstv %s1360_s6  ;;  %s1285_s5 = smov [#allocation11]  }
  0x47   :  { %656 = vmatpush.bf16.msra.mxu0 %v858_v15  ;;  %v951_v15 = vld [vmem:[#allocation9 + $0x118] sm:$0xf0]  ;;  %s761_s26 = sshll.u32 %s1285_s5, 4  ;;  %s762_s26 = int_to_ptr.vmem [resolvable:$true] %s761_s26 }
  0x48   :  { %669 = vmatpush.bf16.msra.mxu1 %v922_v17  ;;  %v954_v17 = vor.u32 %v1109_v14, %v951_v15  ;;  %v710_v14 = vperm.slane %v708_v9, 0  ;;  %v711_v15 = vperm.slane %v708_v9, 1 }
  0x49   :  { %682 = vmatpush.bf16.msra.mxu2 %v986_v33 }
  0x4a   :  { %695 = vmatpush.bf16.msra.mxu3 %v1050_v35  ;;  %v102_v35 = vperm.slane %v98_v25, 2 }
  0x4b   :  { %657 = vmatpush.bf16.msra.mxu0 %v850_v27  ;;  %v100_v27 = vperm.slane %v98_v25, 0 }
  0x4c   :  { %670 = vmatpush.bf16.msra.mxu1 %v914_v29 }
  0x4d   :  { %683 = vmatpush.bf16.msra.mxu2 %v978_v45 }
  0x4e   :  { %696 = vmatpush.bf16.msra.mxu3 %v1042_v47 }
  0x4f   :  { %658 = vmatpush.bf16.msra.mxu0 %v842_v38 }
  0x50   :  { %671 = vmatpush.bf16.msra.mxu1 %v906_v41 }
  0x51   :  { %684 = vmatpush.bf16.msra.mxu2 %v970_v57 }
  0x52   :  { %697 = vmatpush.bf16.msra.mxu3 %v1034_v59 }
  0x53   :  { %659 = vmatpush.bf16.msra.mxu0 %v834_v51 }
  0x54   :  { %672 = vmatpush.bf16.msra.mxu1 %v898_v53 }
  0x55   :  { %685 = vmatpush.bf16.msra.mxu2 %v962_v4 }
  0x56   :  { %698 = vmatpush.bf16.msra.mxu3 %v1026_v8 }
  0x57   :  { %660 = vmatpush.bf16.msra.mxu0 %v826_v63  ;;  %v279_v63 = vperm.slane %v276_v54, 1 }
  0x58   :  { %673 = vmatpush.bf16.msra.mxu1 %v890_v3 }
  0x59   :  { %686 = vmatpush.bf16.msra.mxu2 %v954_v17 }
  0x5a   :  { %699 = vmatpush.bf16.msra.mxu3 %v1018_v19 }
  0x5b   :  { %661 = vmatpush.bf16.msra.mxu0 %v818_v12 }
  0x5c   :  { %674 = vmatpush.bf16.msra.mxu1 %v882_v13 }
  0x5d   :  { %687 = vmatpush.bf16.msra.mxu2 %v946_v23 }
  0x5e   :  { %700 = vmatpush.bf16.msra.mxu3 %v1010_v26 }
  0x9b   :  { %v161_v29 = vpop.f32.mrf.mxu0 }
  0x9c   :  { %v162_v30 = vadd.f32 %v161_v29, %v100_v27  ;;  %v174_v31 = vpop.f32.mrf.mxu1 }
  0x9d   :  { %v175_v32 = vadd.f32 %v174_v31, %v101_v28 }
  0x9e   :  { %v204_v33 = vmax.f32 %v162_v30, 0.0 }
  0x9f   :  { %v205_v34 = vmax.f32 %v175_v32, 0.0 }
  0xa0   :  { %v208_v36 = vpack.c.bf16 %v204_v33, %v204_v33 }
  0xa1   :  { %v209_v38 = vpack.c.bf16 %v205_v34, %v205_v34 }
  0xa2   :  { %610 = vmatmul.bf16.vlgmr.msrb.gmra.mxu0 %v208_v36 }
  0xa3   :  { %v187_v39 = vpop.f32.mrf.mxu2  ;;  %623 = vmatmul.bf16.vlgmr.msrb.gmra.mxu1 %v209_v38  ;;  %v163_v42 = vpop.f32.mrf.mxu0 }
  0xa4   :  { %v188_v40 = vadd.f32 %v187_v39, %v102_v35  ;;  %v200_v41 = vpop.f32.mrf.mxu3  ;;  %v176_v44 = vpop.f32.mrf.mxu1 }
  0xa5   :  { %v201_v43 = vadd.f32 %v200_v41, %v103_v37 }
  0xa6   :  { %v206_v45 = vmax.f32 %v188_v40, 0.0 }
  0xa7   :  { %v207_v46 = vmax.f32 %v201_v43, 0.0 }
  0xa8   :  { %v210_v47 = vpack.c.bf16 %v206_v45, %v206_v45 }
  0xa9   :  { %v211_v48 = vpack.c.bf16 %v207_v46, %v207_v46 }
  0xaa   :  { %636 = vmatmul.bf16.vlgmr.msrb.gmra.mxu2 %v210_v47 }
  0xab   :  { %649 = vmatmul.bf16.vlgmr.msrb.gmra.mxu3 %v211_v48  ;;  %v189_v49 = vpop.f32.mrf.mxu2 }
  0xac   :  { %v202_v50 = vpop.f32.mrf.mxu3 }
  0xb2   :  { %662 = vmatmul.bf16.vlgmr.msra.gmra.mxu0 %v208_v36 }
  0xb3   :  { %675 = vmatmul.bf16.vlgmr.msra.gmra.mxu1 %v209_v38 }
  0xba   :  { %688 = vmatmul.bf16.vlgmr.msra.gmra.mxu2 %v210_v47 }
  0xbb   :  { %701 = vmatmul.bf16.vlgmr.msra.gmra.mxu3 %v211_v48 }
 0x11f   :  { %v611_v51 = vpop.f32.mrf.mxu0 }
 0x120   :  { %v624_v52 = vpop.f32.mrf.mxu1  ;;  %v612_v59 = vadd.f32 %v611_v51, %v278_v56 }
 0x122   :  { %v625_v62 = vadd.f32 %v624_v52, %v612_v59 }
 0x127   :  { %v613_v53 = vpop.f32.mrf.mxu0 }
 0x128   :  { %v626_v55 = vpop.f32.mrf.mxu1 }
 0x12d   :  { %v637_v57 = vpop.f32.mrf.mxu2 }
 0x12e   :  { %v650_v58 = vpop.f32.mrf.mxu3  ;;  %v638_v2 = vadd.f32 %v637_v57, %v625_v62 }
 0x12f   :  { %v663_v60 = vpop.f32.mrf.mxu0 }
 0x130   :  { %v676_v61 = vpop.f32.mrf.mxu1  ;;  %v664_v3 = vadd.f32 %v663_v60, %v279_v63  ;;  %v651_v6 = vadd.f32 %v650_v58, %v638_v2 }
 0x132   :  { %v677_v7 = vadd.f32 %v676_v61, %v664_v3  ;;  %v706_v12 = vmax.f32 %v651_v6, 0.0 }
 0x134   :  { %v714_v17 = vmul.f32 %v710_v14, %v706_v12 }
 0x135   :  { %v639_v0 = vpop.f32.mrf.mxu2 }
 0x136   :  { %v652_v1 = vpop.f32.mrf.mxu3 }
 0x137   :  { %v665_v4 = vpop.f32.mrf.mxu0 }
 0x138   :  { %v678_v5 = vpop.f32.mrf.mxu1 }
 0x13d   :  { %v689_v8 = vpop.f32.mrf.mxu2 }
 0x13e   :  { %v690_v10 = vadd.f32 %v689_v8, %v677_v7  ;;  %v702_v11 = vpop.f32.mrf.mxu3 }
 0x140   :  { %v703_v13 = vadd.f32 %v702_v11, %v690_v10 }
 0x142   :  { %v707_v16 = vmax.f32 %v703_v13, 0.0 }
 0x144   :  { %v715_v18 = vmul.f32 %v711_v15, %v707_v16 }
 0x145   :  { %v691_v19 = vpop.f32.mrf.mxu2 }
 0x146   :  { %v704_v20 = vpop.f32.mrf.mxu3  ;;  %v716_v21 = vadd.f32 %v715_v18, %v714_v17 }
 0x148   :  { %717 = vadd.xlane.f32.xlu0 %v716_v21 }
 0x1bb   :  { %v718_v23 = vpop.xlane.xlu0 %717 }
 0x1bc   :  { %v721_v24 = vadd.f32 %v720_v22, %v718_v23 }
 0x1be   :  { %722 = vxpose.xlu0.b32.start.end [1/1] (short) (narrow) %v721_v24, 8 }
 0x262   :  { %v738_v25 = vpop.trf.xlu0 }
 0x263   :  { %755 = vst.msk [vmem:[#allocation11] sm:$0x1] %vm754_vm1, %v738_v25 }
 0x264   :  { %766 = dma.vmem_to_hbm [thread:$0]  %s762_s26, 16, %s764_s29, [#allocation5]  }
 0x265   :  { %1275 = dma.done.wait [#allocation5], 16  }
 0x266   :  { %1276 = vsyncadd [#allocation5], 4294967280 }
 0x267   :  { %771 = vsyncpa [#allocation4], 1 }
 0x268   :  { %772 = vsyncpa [#allocation7], 1 }
 0x269   :  { %773 = vsyncpa [#allocation10], 1 }
 0x26a   :  { %774 = vsyncpa [#allocation5], 1 }

</bundles_post_ra>
